<compile_context>
chip_gen: v6e
topology: v6e:2x2x1
jax: 0.10.0
libtpu: 0.0.40
codegen_flags: <defaults>
</compile_context>

<pallas_src>
import jax
import jax.numpy as jnp
from jax.experimental import pallas as pl
from jax.experimental.pallas import tpu as pltpu


_TM_CAP = 2048  # max batch rows per grid step (~2048*32*4B = 256 KiB of activations)


def _make_kernel(narrow_out):
    """narrow_out=True: final folded weight is passed transposed as (1, 16) and the
    16->1 projection runs on the VPU/XLU instead of the MXU."""

    def kernel(x_ref, w12_ref, b12_ref, w3_ref, b3_ref, w456_ref, b456_ref, o_ref):
        # fused layer1+layer2 (no activation between them in the PyTorch forward), then ReLU
        h = jnp.dot(x_ref[...], w12_ref[...],
                    preferred_element_type=jnp.float32) + b12_ref[...]
        h = jnp.maximum(h, 0.0)
        # layer3 + ReLU
        h = jnp.dot(h, w3_ref[...],
                    preferred_element_type=jnp.float32) + b3_ref[...]
        h = jnp.maximum(h, 0.0)
        # fused layer4+layer5+layer6 (purely linear chain)
        if narrow_out:
            # (tm,16) * (1,16) broadcast-mul on the VPU, 16-lane reduce on the XLU:
            # avoids an MXU push/pop whose result tile has a single useful lane.
            logits = jnp.sum(h * w456_ref[...], axis=-1, keepdims=True) + b456_ref[...]
        else:
            logits = jnp.dot(h, w456_ref[...],
                             preferred_element_type=jnp.float32) + b456_ref[...]
        # Exact sigmoid in f32: exp(-h) overflow -> inf -> 1/(1+inf) = 0, so no NaN risk.
        # (pl.reciprocal(approx=True) risks exceeding the 1e-4 test tolerance.)
        o_ref[...] = 1.0 / (1.0 + jnp.exp(-logits))

    return kernel


def fold_params(params):
    """Fold the 6 Linear layers into 3 effective layers.

    layer1->layer2 has no nonlinearity between them, and layer4->layer5->layer6 is
    purely linear, so:
        W12  = W1 @ W2              b12  = b1 @ W2 + b2
        W456 = W4 @ W5 @ W6         b456 = (b4 @ W5 + b5) @ W6 + b6
    """
    (w1, b1), (w2, b2), (w3, b3), (w4, b4), (w5, b5), (w6, b6) = params
    w12 = w1 @ w2
    b12 = b1 @ w2 + b2
    w456 = w4 @ w5 @ w6
    b456 = (b4 @ w5 + b5) @ w6 + b6
    return (w12, b12), (w3, b3), (w456, b456)


def prepare_params(params):
    """Fold + pre-shape the weights ONCE at init (hoisted out of the per-call path)."""
    (w12, b12), (w3, b3), (w456, b456) = fold_params(params)
    out_size = w456.shape[1]
    narrow_out = (out_size == 1)
    # For the 1-wide output, pass the folded weight transposed as (1, 16): the single
    # output column lies along lanes, enabling the VPU/XLU path in the kernel.
    w456_k = w456.T if narrow_out else w456
    flat = (w12, b12.reshape(1, -1),
            w3, b3.reshape(1, -1),
            w456_k, b456.reshape(1, -1))
    return flat, narrow_out, out_size


def _round_up(x, m):
    return ((x + m - 1) // m) * m


def _pick_tile(batch):
    bp = _round_up(max(batch, 8), 8)
    if bp <= _TM_CAP:
        # One grid step: best on single-TC v5e/v6e; at these sizes splitting a small batch
        # for v7x megacore costs more in per-step overhead (~0.35 us) than it saves.
        return bp
    # Large batch: split, but into an EVEN number of equal tiles so v7x's two TensorCores
    # get identical work (no straggler tail) under dimension_semantics=("parallel",).
    n = pl.cdiv(bp, _TM_CAP)
    if n % 2:
        n += 1
    return _round_up(pl.cdiv(bp, n), 8)


def mlp_forward(x, prepared, *, tm=None, x_dtype=None):
    """x: (B, input_size) float32.  prepared: output of prepare_params()."""
    flat, narrow_out, out_size = prepared
    B, in_size = x.shape

    if tm is None:
        tm = _pick_tile(B)
    n_tiles = pl.cdiv(B, tm)
    Bp = n_tiles * tm
    if Bp != B:
        # pad batch so no trailing rows are dropped; padded rows are sliced off below
        x = jnp.pad(x, ((0, Bp - B), (0, 0)))

    flat = list(flat)
    if x_dtype is not None:
        # Optional: halve HBM read traffic for x on large, bandwidth-bound batches.
        # Accumulation stays f32 via preferred_element_type; off by default (1e-4 test).
        x = x.astype(x_dtype)
        flat[0] = flat[0].astype(x_dtype)

    in_specs = [pl.BlockSpec((tm, in_size), lambda i: (i, 0))]
    for a in flat:
        # constant block index -> weight/bias tile is DMA'd once and reused across steps
        in_specs.append(pl.BlockSpec(a.shape, lambda i: (0, 0)))

    out = pl.pallas_call(
        _make_kernel(narrow_out),
        out_shape=jax.ShapeDtypeStruct((Bp, out_size), jnp.float32),
        grid_spec=pltpu.PrefetchScalarGridSpec(
            num_scalar_prefetch=0,
            grid=(n_tiles,),
            in_specs=in_specs,
            # out_size=1 -> (tm, 1) block is a lane-sparse (masked) store.  Accepted
            # knowingly: store volume is 4 B/row, and padding or transposing to a
            # lane-dense slab costs more than it saves at these sizes.
            out_specs=pl.BlockSpec((tm, out_size), lambda i: (i, 0)),
        ),
        compiler_params=pltpu.CompilerParams(
            dimension_semantics=("parallel",)),
    )(x, *flat)
    return out[:B]


def init_params(key, input_size, output_size):
    """Deterministic init, PyTorch-Linear-like uniform(-1/sqrt(fan_in), 1/sqrt(fan_in))."""
    dims = [(input_size, 32), (32, 32), (32, 16), (16, 16), (16, 16), (16, output_size)]
    params = []
    for (fan_in, fan_out) in dims:
        key, kw, kb = jax.random.split(key, 3)
        bound = 1.0 / jnp.sqrt(float(fan_in))
        w_t = jax.random.uniform(kw, (fan_in, fan_out), jnp.float32, -bound, bound)
        b = jax.random.uniform(kb, (fan_out,), jnp.float32, -bound, bound)
        params.append((w_t, b))
    return params


def reference_forward(x, params):
    """Unfolded 6-layer reference, matching the PyTorch Model.forward exactly."""
    h = x @ params[0][0] + params[0][1]
    h = h @ params[1][0] + params[1][1]
    h = jnp.maximum(h, 0.0)
    h = h @ params[2][0] + params[2][1]
    h = jnp.maximum(h, 0.0)
    h = h @ params[3][0] + params[3][1]
    h = h @ params[4][0] + params[4][1]
    h = h @ params[5][0] + params[5][1]
    return jax.nn.sigmoid(h)


if __name__ == "__main__":
    input_size = 30   # e.g. breast-cancer dataset features
    output_size = 1
    batch = 256       # <= _TM_CAP -> tm=256, grid=(1,): single grid step, no wasted overhead

    key = jax.random.PRNGKey(0)
    key, kx = jax.random.split(key)
    x = jax.random.normal(kx, (batch, input_size), jnp.float32)
    params = init_params(key, input_size, output_size)

    prepared = prepare_params(params)          # fold layers once at init, not per call
    out = mlp_forward(x, prepared)
    out = jax.block_until_ready(out)

    ref = reference_forward(x, params)
    assert out.shape == (batch, output_size)
    assert jnp.allclose(out, ref, atol=1e-4, rtol=1e-4), "mismatch vs reference"

    print("KERNEL_OK")
</pallas_src>

<mosaic_0001>
module attributes {stable_mosaic.version = 11 : i64} {
  func.func @kernel(%arg0: i32, %arg1: memref<256x30xf32, #tpu.memory_space<vmem>>, %arg2: memref<30x32xf32, #tpu.memory_space<vmem>>, %arg3: memref<1x32xf32, #tpu.memory_space<vmem>>, %arg4: memref<32x16xf32, #tpu.memory_space<vmem>>, %arg5: memref<1x16xf32, #tpu.memory_space<vmem>>, %arg6: memref<1x16xf32, #tpu.memory_space<vmem>>, %arg7: memref<1x1xf32, #tpu.memory_space<vmem>>, %arg8: memref<256x1xf32, #tpu.memory_space<vmem>>) attributes {dimension_semantics = [#tpu.dimension_semantics<parallel>], iteration_bounds = array<i64: 1>, scalar_prefetch = 0 : i64, scratch_operands = 0 : i64, tpu.core_type = #tpu.core_type<tc>, window_params = [{transform_indices = @transform_0, window_bounds = array<i64: 256, 30>}, {pipeline_mode = #tpu.pipeline_mode<synchronous>, transform_indices = @transform_1, window_bounds = array<i64: 30, 32>}, {pipeline_mode = #tpu.pipeline_mode<synchronous>, transform_indices = @transform_2, window_bounds = array<i64: 1, 32>}, {pipeline_mode = #tpu.pipeline_mode<synchronous>, transform_indices = @transform_3, window_bounds = array<i64: 32, 16>}, {pipeline_mode = #tpu.pipeline_mode<synchronous>, transform_indices = @transform_4, window_bounds = array<i64: 1, 16>}, {pipeline_mode = #tpu.pipeline_mode<synchronous>, transform_indices = @transform_5, window_bounds = array<i64: 1, 16>}, {pipeline_mode = #tpu.pipeline_mode<synchronous>, transform_indices = @transform_6, window_bounds = array<i64: 1, 1>}, {transform_indices = @transform_7, window_bounds = array<i64: 256, 1>}]} {
    %c0 = arith.constant 0 : index
    %c0_0 = arith.constant 0 : index
    %0 = vector.load %arg1[%c0, %c0_0] : memref<256x30xf32, #tpu.memory_space<vmem>>, vector<256x30xf32>
    %c0_1 = arith.constant 0 : index
    %c0_2 = arith.constant 0 : index
    %1 = vector.load %arg2[%c0_1, %c0_2] : memref<30x32xf32, #tpu.memory_space<vmem>>, vector<30x32xf32>
    %cst = arith.constant dense<0.000000e+00> : vector<256x32xf32>
    %2 = tpu.matmul %0, %1, %cst {dimension_numbers = #tpu.dot_dimension_numbers<[1], [0], [0], [1], [0, 0, 1, 1], [], []>} : vector<256x30xf32>, vector<30x32xf32>, vector<256x32xf32> -> vector<256x32xf32>
    %c0_3 = arith.constant 0 : index
    %c0_4 = arith.constant 0 : index
    %3 = vector.load %arg3[%c0_3, %c0_4] : memref<1x32xf32, #tpu.memory_space<vmem>>, vector<1x32xf32>
    %4 = vector.broadcast %3 : vector<1x32xf32> to vector<256x32xf32>
    %5 = arith.addf %2, %4 : vector<256x32xf32>
    %cst_5 = arith.constant 0.000000e+00 : f32
    %6 = vector.broadcast %cst_5 : f32 to vector<256x32xf32>
    %7 = arith.maximumf %5, %6 : vector<256x32xf32>
    %c0_6 = arith.constant 0 : index
    %c0_7 = arith.constant 0 : index
    %8 = vector.load %arg4[%c0_6, %c0_7] : memref<32x16xf32, #tpu.memory_space<vmem>>, vector<32x16xf32>
    %cst_8 = arith.constant dense<0.000000e+00> : vector<256x16xf32>
    %9 = tpu.matmul %7, %8, %cst_8 {dimension_numbers = #tpu.dot_dimension_numbers<[1], [0], [0], [1], [0, 0, 1, 1], [], []>} : vector<256x32xf32>, vector<32x16xf32>, vector<256x16xf32> -> vector<256x16xf32>
    %c0_9 = arith.constant 0 : index
    %c0_10 = arith.constant 0 : index
    %10 = vector.load %arg5[%c0_9, %c0_10] : memref<1x16xf32, #tpu.memory_space<vmem>>, vector<1x16xf32>
    %11 = vector.broadcast %10 : vector<1x16xf32> to vector<256x16xf32>
    %12 = arith.addf %9, %11 : vector<256x16xf32>
    %cst_11 = arith.constant 0.000000e+00 : f32
    %13 = vector.broadcast %cst_11 : f32 to vector<256x16xf32>
    %14 = arith.maximumf %12, %13 : vector<256x16xf32>
    %c0_12 = arith.constant 0 : index
    %c0_13 = arith.constant 0 : index
    %15 = vector.load %arg6[%c0_12, %c0_13] : memref<1x16xf32, #tpu.memory_space<vmem>>, vector<1x16xf32>
    %16 = vector.broadcast %15 : vector<1x16xf32> to vector<256x16xf32>
    %17 = arith.mulf %14, %16 : vector<256x16xf32>
    %cst_14 = arith.constant dense<0.000000e+00> : vector<256xf32>
    %18 = vector.multi_reduction <add>, %17, %cst_14 [1] : vector<256x16xf32> to vector<256xf32>
    %19 = vector.shape_cast %18 : vector<256xf32> to vector<256x1xf32>
    %c0_15 = arith.constant 0 : index
    %c0_16 = arith.constant 0 : index
    %20 = vector.load %arg7[%c0_15, %c0_16] : memref<1x1xf32, #tpu.memory_space<vmem>>, vector<1x1xf32>
    %21 = vector.broadcast %20 : vector<1x1xf32> to vector<256x1xf32>
    %22 = arith.addf %19, %21 : vector<256x1xf32>
    %cst_17 = arith.constant 0.000000e+00 : f32
    %23 = vector.broadcast %cst_17 : f32 to vector<256x1xf32>
    %24 = arith.subf %23, %22 : vector<256x1xf32>
    %25 = math.exp %24 : vector<256x1xf32>
    %cst_18 = arith.constant 1.000000e+00 : f32
    %26 = vector.broadcast %cst_18 : f32 to vector<256x1xf32>
    %27 = arith.addf %26, %25 : vector<256x1xf32>
    %cst_19 = arith.constant 1.000000e+00 : f32
    %28 = vector.broadcast %cst_19 : f32 to vector<256x1xf32>
    %29 = arith.divf %28, %27 : vector<256x1xf32>
    %c0_20 = arith.constant 0 : index
    %c0_21 = arith.constant 0 : index
    %30 = vector.load %arg8[%c0_20, %c0_21] : memref<256x1xf32, #tpu.memory_space<vmem>>, vector<256x1xf32>
    tpu.vector_store %arg8[%c0_20, %c0_21], %29 {strides = array<i32>} : memref<256x1xf32, #tpu.memory_space<vmem>>, vector<256x1xf32>,
    return
  }
  func.func @transform_0(%arg0: i32) -> (i32, i32) {
    %c0_i32 = arith.constant 0 : i32
    %c0_i32_0 = arith.constant 0 : i32
    return %arg0, %c0_i32 : i32, i32
  }
  func.func @transform_1(%arg0: i32) -> (i32, i32) {
    %c0_i32 = arith.constant 0 : i32
    %c0_i32_0 = arith.constant 0 : i32
    %c0_i32_1 = arith.constant 0 : i32
    return %c0_i32, %c0_i32_0 : i32, i32
  }
  func.func @transform_2(%arg0: i32) -> (i32, i32) {
    %c0_i32 = arith.constant 0 : i32
    %c0_i32_0 = arith.constant 0 : i32
    %c0_i32_1 = arith.constant 0 : i32
    return %c0_i32, %c0_i32_0 : i32, i32
  }
  func.func @transform_3(%arg0: i32) -> (i32, i32) {
    %c0_i32 = arith.constant 0 : i32
    %c0_i32_0 = arith.constant 0 : i32
    %c0_i32_1 = arith.constant 0 : i32
    return %c0_i32, %c0_i32_0 : i32, i32
  }
  func.func @transform_4(%arg0: i32) -> (i32, i32) {
    %c0_i32 = arith.constant 0 : i32
    %c0_i32_0 = arith.constant 0 : i32
    %c0_i32_1 = arith.constant 0 : i32
    return %c0_i32, %c0_i32_0 : i32, i32
  }
  func.func @transform_5(%arg0: i32) -> (i32, i32) {
    %c0_i32 = arith.constant 0 : i32
    %c0_i32_0 = arith.constant 0 : i32
    %c0_i32_1 = arith.constant 0 : i32
    return %c0_i32, %c0_i32_0 : i32, i32
  }
  func.func @transform_6(%arg0: i32) -> (i32, i32) {
    %c0_i32 = arith.constant 0 : i32
    %c0_i32_0 = arith.constant 0 : i32
    %c0_i32_1 = arith.constant 0 : i32
    return %c0_i32, %c0_i32_0 : i32, i32
  }
  func.func @transform_7(%arg0: i32) -> (i32, i32) {
    %c0_i32 = arith.constant 0 : i32
    %c0_i32_0 = arith.constant 0 : i32
    return %arg0, %c0_i32 : i32, i32
  }
}

</mosaic_0001>

<bundles_post_ra>
// kernel: tpu_custom_call.1
= control target key start
LH: loop header
LB: loop body
LE: loop exit
PB: predicated region body
PF: predicated region fallthrough
CT: control target
= control target key end

     0   :  { %vm168_vm0 = vcmask 1045504   ;;  %vm71_vm1 = vcmask 244736   ;;  %vm440_vm2 = vcmask 261120   ;;  %vm833_vm3 = vcmask 130048   ;;  %s2111_s1 = inlined_call_operand.vmem [shape: f32[30,32], index: 1, kind: input, shape index: {}]   ;;  %s2112_s0 = inlined_call_operand.vmem [shape: f32[256,30], index: 0, kind: input, shape index: {}]   ;;  %s2113_s3 = inlined_call_operand.vmem [shape: f32[32,16], index: 3, kind: input, shape index: {}]   ;;  %s2114_s2 = inlined_call_operand.vmem [shape: f32[1,32], index: 2, kind: input, shape index: {}]   ;;  %s2115_s6 = inlined_call_operand.<no memory space> [shape: f32[1,1], index: 6, kind: input, shape index: {}]   ;;  %s2116_s4 = inlined_call_operand.vmem [shape: f32[1,16], index: 4, kind: input, shape index: {}]   ;;  %s2117_s5 = inlined_call_operand.vmem [shape: f32[1,16], index: 5, kind: input, shape index: {}]   ;;  %s2118_s7 = inlined_call_operand.vmem [shape: f32[256,1], index: 7, kind: output, shape index: {}]  }
   0x1   :  { %v63_v0 = vld [vmem:[%s2111_s1 + $0x18] sm:$0x3f]  ;;  %v62_v1 = vld [vmem:[%s2111_s1 + $0x10] sm:$0xff]  ;;  %v28_v2 = vld [vmem:[%s2112_s0] sm:$0xff]  ;;  %vm1161_vm4 = vcmask 7168  }
   0x2   :  { %1339 = vmatprep.subr.msk.mxu0 %vm168_vm0, %v63_v0  ;;  %v61_v3 = vld [vmem:[%s2111_s1 + $0x8] sm:$0xff]  ;;  %1347 = vmatprep.mubr.msk.f32.mxu0 %vm71_vm1, %v28_v2  ;;  %v60_v4 = vld [vmem:[%s2111_s1] sm:$0xff]  ;;  %v30_v6 = vld [vmem:[%s2112_s0 + $0x10] sm:$0xff] }
   0x3   :  { %1340 = vmatpush3.msk.msra.mxu0 %vm168_vm0, %v63_v0  ;;  %v29_v5 = vld [vmem:[%s2112_s0 + $0x8] sm:$0xff]  ;;  %v31_v7 = vld [vmem:[%s2112_s0 + $0x18] sm:$0xff]  ;;  %v32_v8 = vld [vmem:[%s2112_s0 + $0x20] sm:$0xff] }
   0x4   :  { %1341 = vmatprep.subr.mxu0 %v62_v1  ;;  %v33_v9 = vld [vmem:[%s2112_s0 + $0x28] sm:$0xff]  ;;  %v34_v10 = vld [vmem:[%s2112_s0 + $0x30] sm:$0xff]  ;;  %v35_v11 = vld [vmem:[%s2112_s0 + $0x38] sm:$0xff] }
   0x5   :  { %1342 = vmatpush3.msra.mxu0 %v62_v1  ;;  %v36_v12 = vld [vmem:[%s2112_s0 + $0x40] sm:$0xff]  ;;  %v37_v13 = vld [vmem:[%s2112_s0 + $0x48] sm:$0xff]  ;;  %v38_v14 = vld [vmem:[%s2112_s0 + $0x50] sm:$0xff] }
   0x6   :  { %1343 = vmatprep.subr.mxu0 %v61_v3  ;;  %v39_v15 = vld [vmem:[%s2112_s0 + $0x58] sm:$0xff]  ;;  %v40_v16 = vld [vmem:[%s2112_s0 + $0x60] sm:$0xff]  ;;  %v41_v17 = vld [vmem:[%s2112_s0 + $0x68] sm:$0xff] }
   0x7   :  { %1344 = vmatpush3.msra.mxu0 %v61_v3  ;;  %v42_v18 = vld [vmem:[%s2112_s0 + $0x70] sm:$0xff]  ;;  %v43_v19 = vld [vmem:[%s2112_s0 + $0x78] sm:$0xff]  ;;  %v44_v20 = vld [vmem:[%s2112_s0 + $0x80] sm:$0xff] }
   0x8   :  { %1345 = vmatprep.subr.mxu0 %v60_v4  ;;  %v45_v21 = vld [vmem:[%s2112_s0 + $0x88] sm:$0xff]  ;;  %v46_v22 = vld [vmem:[%s2112_s0 + $0x90] sm:$0xff]  ;;  %v47_v23 = vld [vmem:[%s2112_s0 + $0x98] sm:$0xff] }
   0x9   :  { %1346 = vmatpush3.msra.mxu0 %v60_v4  ;;  %v48_v24 = vld [vmem:[%s2112_s0 + $0xa0] sm:$0xff]  ;;  %v49_v25 = vld [vmem:[%s2112_s0 + $0xa8] sm:$0xff]  ;;  %v50_v26 = vld [vmem:[%s2112_s0 + $0xb0] sm:$0xff] }
   0xa   :  { %1348 = vmatmul.mubr.msk.f32.vlgmr.msra.gmra.mxu0 %vm71_vm1, %v29_v5  ;;  %v51_v27 = vld [vmem:[%s2112_s0 + $0xb8] sm:$0xff]  ;;  %v52_v28 = vld [vmem:[%s2112_s0 + $0xc0] sm:$0xff]  ;;  %v53_v29 = vld [vmem:[%s2112_s0 + $0xc8] sm:$0xff] }
   0xb   :  { %1350 = vmatprep.mubr.msk.f32.mxu0 %vm71_vm1, %v30_v6  ;;  %v54_v30 = vld [vmem:[%s2112_s0 + $0xd0] sm:$0xff]  ;;  %v55_v31 = vld [vmem:[%s2112_s0 + $0xd8] sm:$0xff]  ;;  %v56_v32 = vld [vmem:[%s2112_s0 + $0xe0] sm:$0xff] }
   0xc   :  { %v57_v33 = vld [vmem:[%s2112_s0 + $0xe8] sm:$0xff]  ;;  %v58_v34 = vld [vmem:[%s2112_s0 + $0xf0] sm:$0xff]  ;;  %v59_v35 = vld [vmem:[%s2112_s0 + $0xf8] sm:$0xff] }
   0xd   :  { %v432_v36 = vld [vmem:[%s2113_s3 + $0x18] sm:$0xff]  ;;  %v431_v37 = vld [vmem:[%s2113_s3 + $0x10] sm:$0xff]  ;;  %v430_v38 = vld [vmem:[%s2113_s3 + $0x8] sm:$0xff] }
   0xe   :  { %1351 = vmatmul.mubr.msk.f32.gmra.mxu0 %vm71_vm1, %v31_v7  ;;  %1395 = vmatprep.subr.mxu1 %v432_v36  ;;  %v429_v39 = vld [vmem:[%s2113_s3] sm:$0xff] }
   0xf   :  { %1353 = vmatprep.mubr.msk.f32.mxu0 %vm71_vm1, %v32_v8  ;;  %1396 = vmatpush3.msra.mxu1 %v432_v36  ;;  %v1774_v40 = vld [vmem:[%s2114_s2] ss:$0 sm:$0xff] }
  0x10   :  { %1397 = vmatprep.subr.mxu1 %v431_v37 }
  0x11   :  { %1398 = vmatpush3.msra.mxu1 %v431_v37 }
  0x12   :  { %1354 = vmatmul.mubr.msk.f32.gmra.mxu0 %vm71_vm1, %v33_v9  ;;  %1399 = vmatprep.subr.mxu1 %v430_v38 }
  0x13   :  { %1356 = vmatprep.mubr.msk.f32.mxu0 %vm71_vm1, %v34_v10  ;;  %1400 = vmatpush3.msra.mxu1 %v430_v38 }
  0x14   :  { %1401 = vmatprep.subr.mxu1 %v429_v39 }
  0x15   :  { %1402 = vmatpush3.msra.mxu1 %v429_v39 }
  0x16   :  { %1357 = vmatmul.mubr.msk.f32.gmra.mxu0 %vm71_vm1, %v35_v11 }
  0x17   :  { %1359 = vmatprep.mubr.msk.f32.mxu0 %vm71_vm1, %v36_v12 }
  0x1a   :  { %1360 = vmatmul.mubr.msk.f32.gmra.mxu0 %vm71_vm1, %v37_v13 }
  0x1b   :  { %1362 = vmatprep.mubr.msk.f32.mxu0 %vm71_vm1, %v38_v14 }
  0x1e   :  { %1363 = vmatmul.mubr.msk.f32.gmra.mxu0 %vm71_vm1, %v39_v15 }
  0x1f   :  { %1365 = vmatprep.mubr.msk.f32.mxu0 %vm71_vm1, %v40_v16 }
  0x22   :  { %1366 = vmatmul.mubr.msk.f32.gmra.mxu0 %vm71_vm1, %v41_v17 }
  0x23   :  { %1368 = vmatprep.mubr.msk.f32.mxu0 %vm71_vm1, %v42_v18 }
  0x26   :  { %1369 = vmatmul.mubr.msk.f32.gmra.mxu0 %vm71_vm1, %v43_v19 }
  0x27   :  { %1371 = vmatprep.mubr.msk.f32.mxu0 %vm71_vm1, %v44_v20 }
  0x2a   :  { %1372 = vmatmul.mubr.msk.f32.gmra.mxu0 %vm71_vm1, %v45_v21 }
  0x2b   :  { %1374 = vmatprep.mubr.msk.f32.mxu0 %vm71_vm1, %v46_v22 }
  0x2e   :  { %1375 = vmatmul.mubr.msk.f32.gmra.mxu0 %vm71_vm1, %v47_v23 }
  0x2f   :  { %1377 = vmatprep.mubr.msk.f32.mxu0 %vm71_vm1, %v48_v24 }
  0x32   :  { %1378 = vmatmul.mubr.msk.f32.gmra.mxu0 %vm71_vm1, %v49_v25 }
  0x33   :  { %1380 = vmatprep.mubr.msk.f32.mxu0 %vm71_vm1, %v50_v26 }
  0x36   :  { %1381 = vmatmul.mubr.msk.f32.gmra.mxu0 %vm71_vm1, %v51_v27 }
  0x37   :  { %1383 = vmatprep.mubr.msk.f32.mxu0 %vm71_vm1, %v52_v28 }
  0x3a   :  { %1384 = vmatmul.mubr.msk.f32.gmra.mxu0 %vm71_vm1, %v53_v29 }
  0x3b   :  { %1386 = vmatprep.mubr.msk.f32.mxu0 %vm71_vm1, %v54_v30 }
  0x3e   :  { %1387 = vmatmul.mubr.msk.f32.gmra.mxu0 %vm71_vm1, %v55_v31 }
  0x3f   :  { %1389 = vmatprep.mubr.msk.f32.mxu0 %vm71_vm1, %v56_v32 }
  0x42   :  { %1390 = vmatmul.mubr.msk.f32.gmra.mxu0 %vm71_vm1, %v57_v33 }
  0x43   :  { %1392 = vmatprep.mubr.msk.f32.mxu0 %vm71_vm1, %v58_v34 }
  0x46   :  { %1393 = vmatmul.mubr.msk.f32.gmra.mxu0 %vm71_vm1, %v59_v35 }
  0xca   :  { %v1349_v41 = vpop.f32.mrf.mxu0 }
  0xcb   :  { %v244_v42 = vadd.f32 %v1349_v41, %v1774_v40 }
  0xcc   :  { %v238_v43 = vpop.f32.mrf.mxu0 }
  0xcd   :  { %v239_v44 = vadd.f32 %v1774_v40, %v238_v43  ;;  %v398_v47 = vmax.f32 %v244_v42, 0.0 }
  0xce   :  { %v1352_v45 = vpop.f32.mrf.mxu0 }
  0xcf   :  { %v397_v46 = vmax.f32 %v239_v44, 0.0  ;;  %v254_v48 = vadd.f32 %v1352_v45, %v1774_v40 }
  0xd0   :  { %v248_v49 = vpop.f32.mrf.mxu0 }
  0xd1   :  { %v249_v50 = vadd.f32 %v1774_v40, %v248_v49  ;;  %1403 = vmatprep.mubr.msk.f32.mxu1 %vm440_vm2, %v397_v46  ;;  %v400_v54 = vmax.f32 %v254_v48, 0.0 }
  0xd2   :  { %v1355_v51 = vpop.f32.mrf.mxu0  ;;  %1404 = vmatmul.mubr.msk.f32.vlgmr.msra.gmra.mxu1 %vm440_vm2, %v398_v47 }
  0xd3   :  { %v399_v52 = vmax.f32 %v249_v50, 0.0  ;;  %v264_v53 = vadd.f32 %v1355_v51, %v1774_v40 }
  0xd4   :  { %v258_v55 = vpop.f32.mrf.mxu0 }
  0xd5   :  { %v259_v56 = vadd.f32 %v1774_v40, %v258_v55  ;;  %1406 = vmatprep.mubr.msk.f32.mxu1 %vm440_vm2, %v399_v52  ;;  %v402_v57 = vmax.f32 %v264_v53, 0.0 }
  0xd6   :  { %v1358_v58 = vpop.f32.mrf.mxu0  ;;  %1407 = vmatmul.mubr.msk.f32.gmra.mxu1 %vm440_vm2, %v400_v54 }
  0xd7   :  { %v401_v59 = vmax.f32 %v259_v56, 0.0  ;;  %v274_v60 = vadd.f32 %v1358_v58, %v1774_v40 }
  0xd8   :  { %v268_v61 = vpop.f32.mrf.mxu0 }
  0xd9   :  { %v269_v62 = vadd.f32 %v1774_v40, %v268_v61  ;;  %1409 = vmatprep.mubr.msk.f32.mxu1 %vm440_vm2, %v401_v59  ;;  %v404_v63 = vmax.f32 %v274_v60, 0.0 }
  0xda   :  { %v1361_v0 = vpop.f32.mrf.mxu0  ;;  %1410 = vmatmul.mubr.msk.f32.gmra.mxu1 %vm440_vm2, %v402_v57 }
  0xdb   :  { %v403_v1 = vmax.f32 %v269_v62, 0.0  ;;  %v284_v2 = vadd.f32 %v1361_v0, %v1774_v40 }
  0xdc   :  { %v278_v3 = vpop.f32.mrf.mxu0 }
  0xdd   :  { %v279_v4 = vadd.f32 %v1774_v40, %v278_v3  ;;  %1412 = vmatprep.mubr.msk.f32.mxu1 %vm440_vm2, %v403_v1  ;;  %v406_v5 = vmax.f32 %v284_v2, 0.0 }
  0xde   :  { %v1364_v6 = vpop.f32.mrf.mxu0  ;;  %1413 = vmatmul.mubr.msk.f32.gmra.mxu1 %vm440_vm2, %v404_v63 }
  0xdf   :  { %v405_v7 = vmax.f32 %v279_v4, 0.0  ;;  %v294_v8 = vadd.f32 %v1364_v6, %v1774_v40 }
  0xe0   :  { %v288_v9 = vpop.f32.mrf.mxu0 }
  0xe1   :  { %v289_v10 = vadd.f32 %v1774_v40, %v288_v9  ;;  %1415 = vmatprep.mubr.msk.f32.mxu1 %vm440_vm2, %v405_v7  ;;  %v408_v11 = vmax.f32 %v294_v8, 0.0 }
  0xe2   :  { %v1367_v12 = vpop.f32.mrf.mxu0  ;;  %1416 = vmatmul.mubr.msk.f32.gmra.mxu1 %vm440_vm2, %v406_v5 }
  0xe3   :  { %v407_v13 = vmax.f32 %v289_v10, 0.0  ;;  %v304_v14 = vadd.f32 %v1367_v12, %v1774_v40  ;;  %v12_v10 = vstv %s2115_s6 }
  0xe4   :  { %v298_v15 = vpop.f32.mrf.mxu0  ;;  %13 = vst [vmem:[#allocation2] sm:$0x1] %v12_v10 }
  0xe5   :  { %v299_v16 = vadd.f32 %v1774_v40, %v298_v15  ;;  %1418 = vmatprep.mubr.msk.f32.mxu1 %vm440_vm2, %v407_v13  ;;  %v410_v17 = vmax.f32 %v304_v14, 0.0  ;;  %v1852_v14 = vld [vmem:[%s2117_s5] ss:$0 sm:$0xff] }
  0xe6   :  { %v1370_v18 = vpop.f32.mrf.mxu0  ;;  %1419 = vmatmul.mubr.msk.f32.gmra.mxu1 %vm440_vm2, %v408_v11  ;;  %v1846_v11 = vld [vmem:[%s2116_s4] ss:$0 sm:$0xff] }
  0xe7   :  { %v409_v19 = vmax.f32 %v299_v16, 0.0  ;;  %v314_v20 = vadd.f32 %v1370_v18, %v1774_v40 }
  0xe8   :  { %v308_v21 = vpop.f32.mrf.mxu0 }
  0xe9   :  { %v309_v22 = vadd.f32 %v1774_v40, %v308_v21  ;;  %1421 = vmatprep.mubr.msk.f32.mxu1 %vm440_vm2, %v409_v19  ;;  %v412_v23 = vmax.f32 %v314_v20, 0.0 }
  0xea   :  { %v1373_v24 = vpop.f32.mrf.mxu0  ;;  %1422 = vmatmul.mubr.msk.f32.gmra.mxu1 %vm440_vm2, %v410_v17 }
  0xeb   :  { %v411_v25 = vmax.f32 %v309_v22, 0.0  ;;  %v324_v26 = vadd.f32 %v1373_v24, %v1774_v40 }
  0xec   :  { %v318_v27 = vpop.f32.mrf.mxu0 }
  0xed   :  { %v319_v28 = vadd.f32 %v1774_v40, %v318_v27  ;;  %1424 = vmatprep.mubr.msk.f32.mxu1 %vm440_vm2, %v411_v25  ;;  %v414_v29 = vmax.f32 %v324_v26, 0.0 }
  0xee   :  { %v1376_v30 = vpop.f32.mrf.mxu0  ;;  %1425 = vmatmul.mubr.msk.f32.gmra.mxu1 %vm440_vm2, %v412_v23 }
  0xef   :  { %v413_v31 = vmax.f32 %v319_v28, 0.0  ;;  %v334_v32 = vadd.f32 %v1376_v30, %v1774_v40 }
  0xf0   :  { %v328_v33 = vpop.f32.mrf.mxu0 }
  0xf1   :  { %v329_v34 = vadd.f32 %v1774_v40, %v328_v33  ;;  %1427 = vmatprep.mubr.msk.f32.mxu1 %vm440_vm2, %v413_v31  ;;  %v416_v35 = vmax.f32 %v334_v32, 0.0 }
  0xf2   :  { %v1379_v36 = vpop.f32.mrf.mxu0  ;;  %1428 = vmatmul.mubr.msk.f32.gmra.mxu1 %vm440_vm2, %v414_v29 }
  0xf3   :  { %v415_v37 = vmax.f32 %v329_v34, 0.0  ;;  %v344_v38 = vadd.f32 %v1379_v36, %v1774_v40 }
  0xf4   :  { %v338_v39 = vpop.f32.mrf.mxu0 }
  0xf5   :  { %v339_v41 = vadd.f32 %v1774_v40, %v338_v39  ;;  %1430 = vmatprep.mubr.msk.f32.mxu1 %vm440_vm2, %v415_v37  ;;  %v418_v42 = vmax.f32 %v344_v38, 0.0 }
  0xf6   :  { %v1382_v43 = vpop.f32.mrf.mxu0  ;;  %1431 = vmatmul.mubr.msk.f32.gmra.mxu1 %vm440_vm2, %v416_v35 }
  0xf7   :  { %v417_v44 = vmax.f32 %v339_v41, 0.0  ;;  %v354_v45 = vadd.f32 %v1382_v43, %v1774_v40 }
  0xf8   :  { %v348_v46 = vpop.f32.mrf.mxu0 }
  0xf9   :  { %v349_v47 = vadd.f32 %v1774_v40, %v348_v46  ;;  %1433 = vmatprep.mubr.msk.f32.mxu1 %vm440_vm2, %v417_v44  ;;  %v420_v48 = vmax.f32 %v354_v45, 0.0 }
  0xfa   :  { %v1385_v49 = vpop.f32.mrf.mxu0  ;;  %1434 = vmatmul.mubr.msk.f32.gmra.mxu1 %vm440_vm2, %v418_v42 }
  0xfb   :  { %v419_v50 = vmax.f32 %v349_v47, 0.0  ;;  %v364_v51 = vadd.f32 %v1385_v49, %v1774_v40 }
  0xfc   :  { %v358_v52 = vpop.f32.mrf.mxu0 }
  0xfd   :  { %v359_v53 = vadd.f32 %v1774_v40, %v358_v52  ;;  %1436 = vmatprep.mubr.msk.f32.mxu1 %vm440_vm2, %v419_v50  ;;  %v422_v54 = vmax.f32 %v364_v51, 0.0 }
  0xfe   :  { %v1388_v55 = vpop.f32.mrf.mxu0  ;;  %1437 = vmatmul.mubr.msk.f32.gmra.mxu1 %vm440_vm2, %v420_v48 }
  0xff   :  { %v421_v56 = vmax.f32 %v359_v53, 0.0  ;;  %v374_v57 = vadd.f32 %v1388_v55, %v1774_v40 }
 0x100   :  { %v368_v58 = vpop.f32.mrf.mxu0 }
 0x101   :  { %v369_v59 = vadd.f32 %v1774_v40, %v368_v58  ;;  %1439 = vmatprep.mubr.msk.f32.mxu1 %vm440_vm2, %v421_v56  ;;  %v424_v60 = vmax.f32 %v374_v57, 0.0 }
 0x102   :  { %v1391_v61 = vpop.f32.mrf.mxu0  ;;  %1440 = vmatmul.mubr.msk.f32.gmra.mxu1 %vm440_vm2, %v422_v54 }
 0x103   :  { %v423_v62 = vmax.f32 %v369_v59, 0.0  ;;  %v384_v63 = vadd.f32 %v1391_v61, %v1774_v40 }
 0x104   :  { %v378_v0 = vpop.f32.mrf.mxu0 }
 0x105   :  { %v379_v1 = vadd.f32 %v1774_v40, %v378_v0  ;;  %1442 = vmatprep.mubr.msk.f32.mxu1 %vm440_vm2, %v423_v62  ;;  %v426_v2 = vmax.f32 %v384_v63, 0.0 }
 0x106   :  { %v1394_v3 = vpop.f32.mrf.mxu0  ;;  %1443 = vmatmul.mubr.msk.f32.gmra.mxu1 %vm440_vm2, %v424_v60 }
 0x107   :  { %v425_v4 = vmax.f32 %v379_v1, 0.0  ;;  %v394_v5 = vadd.f32 %v1394_v3, %v1774_v40 }
 0x108   :  { %v388_v6 = vpop.f32.mrf.mxu0 }
 0x109   :  { %v389_v7 = vadd.f32 %v1774_v40, %v388_v6  ;;  %1445 = vmatprep.mubr.msk.f32.mxu1 %vm440_vm2, %v425_v4  ;;  %v428_v8 = vmax.f32 %v394_v5, 0.0 }
 0x10a   :  { %1446 = vmatmul.mubr.msk.f32.gmra.mxu1 %vm440_vm2, %v426_v2 }
 0x10b   :  { %v427_v9 = vmax.f32 %v389_v7, 0.0 }
 0x10d   :  { %1448 = vmatprep.mubr.msk.f32.mxu1 %vm440_vm2, %v427_v9 }
 0x10e   :  { %1449 = vmatmul.mubr.msk.f32.gmra.mxu1 %vm440_vm2, %v428_v8 }
 0x192   :  { %v1405_v40 = vpop.f32.mrf.mxu1 }
 0x193   :  { %v609_v12 = vadd.f32 %v1405_v40, %v1846_v11 }
 0x194   :  { %v603_v13 = vpop.f32.mrf.mxu1 }
 0x195   :  { %v763_v15 = vmax.f32 %v609_v12, 0.0  ;;  %v604_v16 = vadd.f32 %v1846_v11, %v603_v13 }
 0x196   :  { %v1408_v17 = vpop.f32.mrf.mxu1 }
 0x197   :  { %v762_v18 = vmax.f32 %v604_v16, 0.0  ;;  %v619_v19 = vadd.f32 %v1408_v17, %v1846_v11  ;;  %v802_v20 = vmul.f32 %v1852_v14, %v763_v15 }
 0x198   :  { %v613_v21 = vpop.f32.mrf.mxu1 }
 0x199   :  { %v765_v22 = vmax.f32 %v619_v19, 0.0  ;;  %v614_v23 = vadd.f32 %v1846_v11, %v613_v21  ;;  %v837_v24 = vsel %vm833_vm3, %v802_v20, 0.0  ;;  %v801_v25 = vmul.f32 %v1852_v14, %v762_v18 }
 0x19a   :  { %838 = vadd.xlane.f32.xlu0 %v837_v24  ;;  %v1411_v26 = vpop.f32.mrf.mxu1 }
 0x19b   :  { %v764_v27 = vmax.f32 %v614_v23, 0.0  ;;  %v629_v28 = vadd.f32 %v1411_v26, %v1846_v11  ;;  %v804_v29 = vmul.f32 %v1852_v14, %v765_v22  ;;  %v834_v31 = vsel %vm833_vm3, %v801_v25, 0.0 }
 0x19c   :  { %v623_v30 = vpop.f32.mrf.mxu1 }
 0x19d   :  { %v767_v32 = vmax.f32 %v629_v28, 0.0  ;;  %v624_v33 = vadd.f32 %v1846_v11, %v623_v30  ;;  %v843_v34 = vsel %vm833_vm3, %v804_v29, 0.0  ;;  %v803_v35 = vmul.f32 %v1852_v14, %v764_v27 }
 0x19e   :  { %844 = vadd.xlane.f32.xlu1 %v843_v34  ;;  %v1414_v36 = vpop.f32.mrf.mxu1  ;;  %835 = vadd.xlane.f32.xlu0 %v834_v31 }
 0x19f   :  { %v766_v37 = vmax.f32 %v624_v33, 0.0  ;;  %v639_v38 = vadd.f32 %v1414_v36, %v1846_v11  ;;  %v840_v41 = vsel %vm833_vm3, %v803_v35, 0.0  ;;  %v806_v45 = vmul.f32 %v1852_v14, %v767_v32 }
 0x1a0   :  { %v633_v39 = vpop.f32.mrf.mxu1 }
 0x1a1   :  { %v769_v42 = vmax.f32 %v639_v38, 0.0  ;;  %v634_v43 = vadd.f32 %v1846_v11, %v633_v39  ;;  %v805_v44 = vmul.f32 %v1852_v14, %v766_v37  ;;  %v849_v54 = vsel %vm833_vm3, %v806_v45, 0.0 }
 0x1a2   :  { %v1417_v46 = vpop.f32.mrf.mxu1  ;;  %841 = vadd.xlane.f32.xlu1 %v840_v41 }
 0x1a3   :  { %v768_v47 = vmax.f32 %v634_v43, 0.0  ;;  %v649_v48 = vadd.f32 %v1417_v46, %v1846_v11  ;;  %v846_v49 = vsel %vm833_vm3, %v805_v44, 0.0  ;;  %v808_v51 = vmul.f32 %v1852_v14, %v769_v42 }
 0x1a4   :  { %v643_v50 = vpop.f32.mrf.mxu1  ;;  %847 = vadd.xlane.f32.xlu0 %v846_v49 }
 0x1a5   :  { %v771_v52 = vmax.f32 %v649_v48, 0.0  ;;  %v644_v53 = vadd.f32 %v1846_v11, %v643_v50  ;;  %v807_v55 = vmul.f32 %v1852_v14, %v768_v47  ;;  %v855_v61 = vsel %vm833_vm3, %v808_v51, 0.0 }
 0x1a6   :  { %v1420_v56 = vpop.f32.mrf.mxu1  ;;  %850 = vadd.xlane.f32.xlu1 %v849_v54 }
 0x1a7   :  { %v770_v57 = vmax.f32 %v644_v53, 0.0  ;;  %v659_v58 = vadd.f32 %v1420_v56, %v1846_v11  ;;  %v852_v59 = vsel %vm833_vm3, %v807_v55, 0.0  ;;  %v810_v1 = vmul.f32 %v1852_v14, %v771_v52 }
 0x1a8   :  { %v653_v60 = vpop.f32.mrf.mxu1  ;;  %853 = vadd.xlane.f32.xlu0 %v852_v59 }
 0x1a9   :  { %v773_v62 = vmax.f32 %v659_v58, 0.0  ;;  %v654_v63 = vadd.f32 %v1846_v11, %v653_v60  ;;  %v809_v0 = vmul.f32 %v1852_v14, %v770_v57  ;;  %v861_v10 = vsel %vm833_vm3, %v810_v1, 0.0 }
 0x1aa   :  { %v1423_v2 = vpop.f32.mrf.mxu1  ;;  %856 = vadd.xlane.f32.xlu1 %v855_v61 }
 0x1ab   :  { %v772_v3 = vmax.f32 %v654_v63, 0.0  ;;  %v669_v4 = vadd.f32 %v1423_v2, %v1846_v11  ;;  %v858_v5 = vsel %vm833_vm3, %v809_v0, 0.0  ;;  %v812_v7 = vmul.f32 %v1852_v14, %v773_v62 }
 0x1ac   :  { %v663_v6 = vpop.f32.mrf.mxu1  ;;  %859 = vadd.xlane.f32.xlu0 %v858_v5 }
 0x1ad   :  { %v775_v8 = vmax.f32 %v669_v4, 0.0  ;;  %v664_v9 = vadd.f32 %v1846_v11, %v663_v6  ;;  %v811_v40 = vmul.f32 %v1852_v14, %v772_v3  ;;  %v867_v18 = vsel %vm833_vm3, %v812_v7, 0.0 }
 0x1ae   :  { %v1426_v12 = vpop.f32.mrf.mxu1  ;;  %862 = vadd.xlane.f32.xlu1 %v861_v10 }
 0x1af   :  { %v774_v13 = vmax.f32 %v664_v9, 0.0  ;;  %v679_v15 = vadd.f32 %v1426_v12, %v1846_v11  ;;  %v864_v16 = vsel %vm833_vm3, %v811_v40, 0.0  ;;  %v814_v22 = vmul.f32 %v1852_v14, %v775_v8 }
 0x1b0   :  { %v673_v17 = vpop.f32.mrf.mxu1  ;;  %865 = vadd.xlane.f32.xlu0 %v864_v16 }
 0x1b1   :  { %v777_v19 = vmax.f32 %v679_v15, 0.0  ;;  %v674_v20 = vadd.f32 %v1846_v11, %v673_v17  ;;  %v813_v21 = vmul.f32 %v1852_v14, %v774_v13  ;;  %v873_v31 = vsel %vm833_vm3, %v814_v22, 0.0 }
 0x1b2   :  { %v1429_v23 = vpop.f32.mrf.mxu1  ;;  %868 = vadd.xlane.f32.xlu1 %v867_v18 }
 0x1b3   :  { %v776_v24 = vmax.f32 %v674_v20, 0.0  ;;  %v689_v25 = vadd.f32 %v1429_v23, %v1846_v11  ;;  %v870_v26 = vsel %vm833_vm3, %v813_v21, 0.0  ;;  %v816_v28 = vmul.f32 %v1852_v14, %v777_v19 }
 0x1b4   :  { %v683_v27 = vpop.f32.mrf.mxu1  ;;  %871 = vadd.xlane.f32.xlu0 %v870_v26 }
 0x1b5   :  { %v779_v29 = vmax.f32 %v689_v25, 0.0  ;;  %v684_v30 = vadd.f32 %v1846_v11, %v683_v27  ;;  %v815_v32 = vmul.f32 %v1852_v14, %v776_v24  ;;  %v879_v38 = vsel %vm833_vm3, %v816_v28, 0.0 }
 0x1b6   :  { %v1432_v33 = vpop.f32.mrf.mxu1  ;;  %874 = vadd.xlane.f32.xlu1 %v873_v31 }
 0x1b7   :  { %v778_v34 = vmax.f32 %v684_v30, 0.0  ;;  %v699_v35 = vadd.f32 %v1432_v33, %v1846_v11  ;;  %v876_v36 = vsel %vm833_vm3, %v815_v32, 0.0  ;;  %v818_v43 = vmul.f32 %v1852_v14, %v779_v29 }
 0x1b8   :  { %v693_v37 = vpop.f32.mrf.mxu1  ;;  %877 = vadd.xlane.f32.xlu0 %v876_v36 }
 0x1b9   :  { %v781_v39 = vmax.f32 %v699_v35, 0.0  ;;  %v694_v41 = vadd.f32 %v1846_v11, %v693_v37  ;;  %v817_v42 = vmul.f32 %v1852_v14, %v778_v34  ;;  %v885_v52 = vsel %vm833_vm3, %v818_v43, 0.0 }
 0x1ba   :  { %v1435_v44 = vpop.f32.mrf.mxu1  ;;  %880 = vadd.xlane.f32.xlu1 %v879_v38 }
 0x1bb   :  { %v780_v45 = vmax.f32 %v694_v41, 0.0  ;;  %v709_v46 = vadd.f32 %v1435_v44, %v1846_v11  ;;  %v882_v47 = vsel %vm833_vm3, %v817_v42, 0.0  ;;  %v820_v49 = vmul.f32 %v1852_v14, %v781_v39 }
 0x1bc   :  { %v703_v48 = vpop.f32.mrf.mxu1  ;;  %883 = vadd.xlane.f32.xlu0 %v882_v47 }
 0x1bd   :  { %v783_v50 = vmax.f32 %v709_v46, 0.0  ;;  %v704_v51 = vadd.f32 %v1846_v11, %v703_v48  ;;  %v819_v53 = vmul.f32 %v1852_v14, %v780_v45  ;;  %v891_v59 = vsel %vm833_vm3, %v820_v49, 0.0  ;;  %v1949_v48 = vld [vmem:[#allocation2] ss:$0 sm:$0xff] }
 0x1be   :  { %v1438_v54 = vpop.f32.mrf.mxu1  ;;  %886 = vadd.xlane.f32.xlu1 %v885_v52 }
 0x1bf   :  { %v782_v55 = vmax.f32 %v704_v51, 0.0  ;;  %v719_v56 = vadd.f32 %v1438_v54, %v1846_v11  ;;  %v888_v57 = vsel %vm833_vm3, %v819_v53, 0.0  ;;  %v822_v63 = vmul.f32 %v1852_v14, %v783_v50 }
 0x1c0   :  { %v713_v58 = vpop.f32.mrf.mxu1  ;;  %889 = vadd.xlane.f32.xlu0 %v888_v57 }
 0x1c1   :  { %v785_v60 = vmax.f32 %v719_v56, 0.0  ;;  %v714_v61 = vadd.f32 %v1846_v11, %v713_v58  ;;  %v821_v62 = vmul.f32 %v1852_v14, %v782_v55  ;;  %v897_v8 = vsel %vm833_vm3, %v822_v63, 0.0 }
 0x1c2   :  { %v1441_v0 = vpop.f32.mrf.mxu1  ;;  %892 = vadd.xlane.f32.xlu1 %v891_v59 }
 0x1c3   :  { %v784_v1 = vmax.f32 %v714_v61, 0.0  ;;  %v729_v2 = vadd.f32 %v1441_v0, %v1846_v11  ;;  %v894_v3 = vsel %vm833_vm3, %v821_v62, 0.0  ;;  %v824_v5 = vmul.f32 %v1852_v14, %v785_v60 }
 0x1c4   :  { %v723_v4 = vpop.f32.mrf.mxu1  ;;  %895 = vadd.xlane.f32.xlu0 %v894_v3 }
 0x1c5   :  { %v787_v6 = vmax.f32 %v729_v2, 0.0  ;;  %v724_v7 = vadd.f32 %v1846_v11, %v723_v4  ;;  %v823_v9 = vmul.f32 %v1852_v14, %v784_v1  ;;  %v903_v16 = vsel %vm833_vm3, %v824_v5, 0.0 }
 0x1c6   :  { %v1444_v10 = vpop.f32.mrf.mxu1  ;;  %898 = vadd.xlane.f32.xlu1 %v897_v8 }
 0x1c7   :  { %v786_v40 = vmax.f32 %v724_v7, 0.0  ;;  %v739_v12 = vadd.f32 %v1444_v10, %v1846_v11  ;;  %v900_v13 = vsel %vm833_vm3, %v823_v9, 0.0  ;;  %v826_v20 = vmul.f32 %v1852_v14, %v787_v6 }
 0x1c8   :  { %v733_v15 = vpop.f32.mrf.mxu1  ;;  %901 = vadd.xlane.f32.xlu0 %v900_v13 }
 0x1c9   :  { %v789_v17 = vmax.f32 %v739_v12, 0.0  ;;  %v734_v18 = vadd.f32 %v1846_v11, %v733_v15  ;;  %v825_v19 = vmul.f32 %v1852_v14, %v786_v40  ;;  %v909_v29 = vsel %vm833_vm3, %v826_v20, 0.0 }
 0x1ca   :  { %v1447_v21 = vpop.f32.mrf.mxu1  ;;  %904 = vadd.xlane.f32.xlu1 %v903_v16 }
 0x1cb   :  { %v788_v22 = vmax.f32 %v734_v18, 0.0  ;;  %v749_v23 = vadd.f32 %v1447_v21, %v1846_v11  ;;  %v906_v24 = vsel %vm833_vm3, %v825_v19, 0.0  ;;  %v828_v26 = vmul.f32 %v1852_v14, %v789_v17 }
 0x1cc   :  { %v743_v25 = vpop.f32.mrf.mxu1  ;;  %907 = vadd.xlane.f32.xlu0 %v906_v24 }
 0x1cd   :  { %v791_v27 = vmax.f32 %v749_v23, 0.0  ;;  %v744_v28 = vadd.f32 %v1846_v11, %v743_v25  ;;  %v827_v30 = vmul.f32 %v1852_v14, %v788_v22  ;;  %v915_v36 = vsel %vm833_vm3, %v828_v26, 0.0 }
 0x1ce   :  { %v1450_v31 = vpop.f32.mrf.mxu1  ;;  %910 = vadd.xlane.f32.xlu1 %v909_v29 }
 0x1cf   :  { %v790_v32 = vmax.f32 %v744_v28, 0.0  ;;  %v759_v33 = vadd.f32 %v1450_v31, %v1846_v11  ;;  %v912_v34 = vsel %vm833_vm3, %v827_v30, 0.0  ;;  %v830_v41 = vmul.f32 %v1852_v14, %v791_v27 }
 0x1d0   :  { %v753_v35 = vpop.f32.mrf.mxu1  ;;  %913 = vadd.xlane.f32.xlu0 %v912_v34 }
 0x1d1   :  { %v793_v37 = vmax.f32 %v759_v33, 0.0  ;;  %v754_v38 = vadd.f32 %v1846_v11, %v753_v35  ;;  %v829_v39 = vmul.f32 %v1852_v14, %v790_v32  ;;  %v921_v45 = vsel %vm833_vm3, %v830_v41, 0.0 }
 0x1d2   :  { %916 = vadd.xlane.f32.xlu1 %v915_v36 }
 0x1d3   :  { %v792_v42 = vmax.f32 %v754_v38, 0.0  ;;  %v918_v43 = vsel %vm833_vm3, %v829_v39, 0.0  ;;  %v832_v44 = vmul.f32 %v1852_v14, %v793_v37 }
 0x1d4   :  { %919 = vadd.xlane.f32.xlu0 %v918_v43 }
 0x1d5   :  { %v831_v46 = vmul.f32 %v1852_v14, %v792_v42  ;;  %v927_v47 = vsel %vm833_vm3, %v832_v44, 0.0 }
 0x1d6   :  { %922 = vadd.xlane.f32.xlu1 %v921_v45 }
 0x1d7   :  { %v924_v11 = vsel %vm833_vm3, %v831_v46, 0.0 }
 0x1d8   :  { %925 = vadd.xlane.f32.xlu0 %v924_v11 }
 0x1da   :  { %928 = vadd.xlane.f32.xlu1 %v927_v47 }
 0x223   :  { %v839_v49 = vpop.xlane.xlu0 %838 }
 0x224   :  { %v938_v50 = vadd.f32 %v1949_v48, %v839_v49 }
 0x226   :  { %v970_v51 = vsub.f32 0.0, %v938_v50 }
 0x227   :  { %v845_v52 = vpop.xlane.xlu1 %844  ;;  %v836_v53 = vpop.xlane.xlu0 %835 }
 0x228   :  { %v1003_v54 = vmul.f32 1.442695, %v970_v51  ;;  %v940_v55 = vadd.f32 %v1949_v48, %v845_v52  ;;  %v937_v14 = vadd.f32 %v1949_v48, %v836_v53 }
 0x22a   :  { %1451 = vpow2.f32 %v1003_v54  ;;  %v972_v56 = vsub.f32 0.0, %v940_v55  ;;  %v969_v57 = vsub.f32 0.0, %v937_v14 }
 0x22b   :  { %v842_v58 = vpop.xlane.xlu1 %841 }
 0x22c   :  { %v1007_v59 = vmul.f32 1.442695, %v972_v56  ;;  %v1001_v60 = vmul.f32 1.442695, %v969_v57  ;;  %v939_v61 = vadd.f32 %v1949_v48, %v842_v58 }
 0x22d   :  { %v848_v62 = vpop.xlane.xlu0 %847 }
 0x22e   :  { %1453 = vpow2.f32 %v1007_v59  ;;  %v971_v63 = vsub.f32 0.0, %v939_v61  ;;  %v941_v0 = vadd.f32 %v1949_v48, %v848_v62 }
 0x22f   :  { %1455 = vpow2.f32 %v1001_v60  ;;  %v851_v1 = vpop.xlane.xlu1 %850 }
 0x230   :  { %v1005_v2 = vmul.f32 1.442695, %v971_v63  ;;  %v973_v3 = vsub.f32 0.0, %v941_v0  ;;  %v942_v4 = vadd.f32 %v1949_v48, %v851_v1 }
 0x231   :  { %v854_v5 = vpop.xlane.xlu0 %853 }
 0x232   :  { %1457 = vpow2.f32 %v1005_v2  ;;  %v1009_v6 = vmul.f32 1.442695, %v973_v3  ;;  %v974_v7 = vsub.f32 0.0, %v942_v4  ;;  %v943_v8 = vadd.f32 %v1949_v48, %v854_v5 }
 0x233   :  { %v857_v9 = vpop.xlane.xlu1 %856 }
 0x234   :  { %1459 = vpow2.f32 %v1009_v6  ;;  %v1011_v10 = vmul.f32 1.442695, %v974_v7  ;;  %v975_v40 = vsub.f32 0.0, %v943_v8  ;;  %v944_v12 = vadd.f32 %v1949_v48, %v857_v9 }
 0x235   :  { %v860_v13 = vpop.xlane.xlu0 %859 }
 0x236   :  { %1461 = vpow2.f32 %v1011_v10  ;;  %v1013_v15 = vmul.f32 1.442695, %v975_v40  ;;  %v976_v16 = vsub.f32 0.0, %v944_v12  ;;  %v945_v17 = vadd.f32 %v1949_v48, %v860_v13 }
 0x237   :  { %v1452_v18 = vpop.eup %1451  ;;  %v863_v19 = vpop.xlane.xlu1 %862 }
 0x238   :  { %v1066_v20 = vadd.f32 1.0, %v1452_v18  ;;  %1463 = vpow2.f32 %v1013_v15  ;;  %v1015_v21 = vmul.f32 1.442695, %v976_v16  ;;  %v977_v22 = vsub.f32 0.0, %v945_v17 }
 0x239   :  { %v946_v23 = vadd.f32 %v1949_v48, %v863_v19  ;;  %v866_v24 = vpop.xlane.xlu0 %865 }
 0x23a   :  { %1465 = vrcp.f32 %v1066_v20  ;;  %v1017_v25 = vmul.f32 1.442695, %v977_v22  ;;  %v947_v26 = vadd.f32 %v1949_v48, %v866_v24 }
 0x23b   :  { %v1454_v27 = vpop.eup %1453  ;;  %1467 = vpow2.f32 %v1015_v21  ;;  %v978_v28 = vsub.f32 0.0, %v946_v23  ;;  %v869_v29 = vpop.xlane.xlu1 %868 }
 0x23c   :  { %v1456_v30 = vpop.eup %1455  ;;  %v1068_v31 = vadd.f32 1.0, %v1454_v27  ;;  %1469 = vpow2.f32 %v1017_v25  ;;  %v979_v32 = vsub.f32 0.0, %v947_v26  ;;  %v948_v33 = vadd.f32 %v1949_v48, %v869_v29 }
 0x23d   :  { %v1065_v34 = vadd.f32 1.0, %v1456_v30  ;;  %v1019_v35 = vmul.f32 1.442695, %v978_v28  ;;  %v872_v36 = vpop.xlane.xlu0 %871 }
 0x23e   :  { %1471 = vrcp.f32 %v1068_v31  ;;  %v1021_v37 = vmul.f32 1.442695, %v979_v32  ;;  %v980_v38 = vsub.f32 0.0, %v948_v33  ;;  %v949_v39 = vadd.f32 %v1949_v48, %v872_v36 }
 0x23f   :  { %v1458_v41 = vpop.eup %1457  ;;  %1473 = vrcp.f32 %v1065_v34  ;;  %v875_v42 = vpop.xlane.xlu1 %874 }
 0x240   :  { %v1067_v43 = vadd.f32 1.0, %v1458_v41  ;;  %1475 = vpow2.f32 %v1019_v35  ;;  %v1023_v44 = vmul.f32 1.442695, %v980_v38  ;;  %v981_v45 = vsub.f32 0.0, %v949_v39 }
 0x241   :  { %v1460_v46 = vpop.eup %1459  ;;  %1477 = vpow2.f32 %v1021_v37  ;;  %v950_v47 = vadd.f32 %v1949_v48, %v875_v42  ;;  %v878_v11 = vpop.xlane.xlu0 %877 }
 0x242   :  { %1479 = vrcp.f32 %v1067_v43  ;;  %v1069_v49 = vadd.f32 1.0, %v1460_v46  ;;  %v1025_v50 = vmul.f32 1.442695, %v981_v45  ;;  %v951_v51 = vadd.f32 %v1949_v48, %v878_v11 }
 0x243   :  { %v1462_v52 = vpop.eup %1461  ;;  %1481 = vpow2.f32 %v1023_v44  ;;  %v982_v53 = vsub.f32 0.0, %v950_v47  ;;  %v881_v54 = vpop.xlane.xlu1 %880 }
 0x244   :  { %1483 = vrcp.f32 %v1069_v49  ;;  %v1070_v55 = vadd.f32 1.0, %v1462_v52  ;;  %v983_v14 = vsub.f32 0.0, %v951_v51  ;;  %v952_v56 = vadd.f32 %v1949_v48, %v881_v54 }
 0x245   :  { %v1464_v57 = vpop.eup %1463  ;;  %1485 = vpow2.f32 %v1025_v50  ;;  %v1027_v58 = vmul.f32 1.442695, %v982_v53  ;;  %v884_v59 = vpop.xlane.xlu0 %883 }
 0x246   :  { %1487 = vrcp.f32 %v1070_v55  ;;  %v1071_v60 = vadd.f32 1.0, %v1464_v57  ;;  %v1029_v61 = vmul.f32 1.442695, %v983_v14  ;;  %v984_v62 = vsub.f32 0.0, %v952_v56 }
 0x247   :  { %v1466_v63 = vpop.eup %1465  ;;  %1489 = vpow2.f32 %v1027_v58  ;;  %v953_v0 = vadd.f32 %v1949_v48, %v884_v59  ;;  %v887_v1 = vpop.xlane.xlu1 %886 }
 0x248   :  { %v1468_v2 = vpop.eup %1467  ;;  %1163 = vst.msk [vmem:[%s2118_s7 + $0x8] sm:$0xff] %vm1161_vm4, %v1466_v63  ;;  %1491 = vrcp.f32 %v1071_v60  ;;  %v1031_v3 = vmul.f32 1.442695, %v984_v62  ;;  %v954_v4 = vadd.f32 %v1949_v48, %v887_v1 }
 0x249   :  { %v1470_v5 = vpop.eup %1469  ;;  %v1072_v6 = vadd.f32 1.0, %v1468_v2  ;;  %1493 = vpow2.f32 %v1029_v61  ;;  %v985_v7 = vsub.f32 0.0, %v953_v0  ;;  %v890_v8 = vpop.xlane.xlu0 %889 }
 0x24a   :  { %v1073_v9 = vadd.f32 1.0, %v1470_v5  ;;  %1495 = vpow2.f32 %v1031_v3  ;;  %v986_v10 = vsub.f32 0.0, %v954_v4  ;;  %v955_v40 = vadd.f32 %v1949_v48, %v890_v8 }
 0x24b   :  { %v1472_v12 = vpop.eup %1471  ;;  %1497 = vrcp.f32 %v1072_v6  ;;  %v1033_v13 = vmul.f32 1.442695, %v985_v7  ;;  %v893_v15 = vpop.xlane.xlu1 %892 }
 0x24c   :  { %v1474_v16 = vpop.eup %1473  ;;  %1165 = vst.msk [vmem:[%s2118_s7 + $0x18] sm:$0xff] %vm1161_vm4, %v1472_v12  ;;  %1499 = vrcp.f32 %v1073_v9  ;;  %v1035_v17 = vmul.f32 1.442695, %v986_v10  ;;  %v987_v18 = vsub.f32 0.0, %v955_v40  ;;  %v956_v19 = vadd.f32 %v1949_v48, %v893_v15 }
 0x24d   :  { %v1476_v20 = vpop.eup %1475  ;;  %1162 = vst.msk [vmem:[%s2118_s7] sm:$0xff] %vm1161_vm4, %v1474_v16  ;;  %1501 = vpow2.f32 %v1033_v13  ;;  %v896_v21 = vpop.xlane.xlu0 %895 }
 0x24e   :  { %v1478_v22 = vpop.eup %1477  ;;  %v1074_v23 = vadd.f32 1.0, %v1476_v20  ;;  %1503 = vpow2.f32 %v1035_v17  ;;  %v1037_v24 = vmul.f32 1.442695, %v987_v18  ;;  %v988_v25 = vsub.f32 0.0, %v956_v19 }
 0x24f   :  { %v1480_v26 = vpop.eup %1479  ;;  %v1075_v27 = vadd.f32 1.0, %v1478_v22  ;;  %v957_v28 = vadd.f32 %v1949_v48, %v896_v21  ;;  %v899_v29 = vpop.xlane.xlu1 %898 }
 0x250   :  { %v1482_v30 = vpop.eup %1481  ;;  %1164 = vst.msk [vmem:[%s2118_s7 + $0x10] sm:$0xff] %vm1161_vm4, %v1480_v26  ;;  %1505 = vrcp.f32 %v1074_v23  ;;  %v1039_v31 = vmul.f32 1.442695, %v988_v25  ;;  %v958_v32 = vadd.f32 %v1949_v48, %v899_v29 }
 0x251   :  { %v1484_v33 = vpop.eup %1483  ;;  %1507 = vrcp.f32 %v1075_v27  ;;  %v1076_v34 = vadd.f32 1.0, %v1482_v30  ;;  %v989_v35 = vsub.f32 0.0, %v957_v28  ;;  %v902_v36 = vpop.xlane.xlu0 %901 }
 0x252   :  { %v1486_v37 = vpop.eup %1485  ;;  %1166 = vst.msk [vmem:[%s2118_s7 + $0x20] sm:$0xff] %vm1161_vm4, %v1484_v33  ;;  %1509 = vpow2.f32 %v1037_v24  ;;  %v990_v38 = vsub.f32 0.0, %v958_v32  ;;  %v959_v39 = vadd.f32 %v1949_v48, %v902_v36 }
 0x253   :  { %v1488_v41 = vpop.eup %1487  ;;  %1511 = vrcp.f32 %v1076_v34  ;;  %v1077_v42 = vadd.f32 1.0, %v1486_v37  ;;  %v1041_v43 = vmul.f32 1.442695, %v989_v35  ;;  %v905_v44 = vpop.xlane.xlu1 %904 }
 0x254   :  { %v1490_v45 = vpop.eup %1489  ;;  %1167 = vst.msk [vmem:[%s2118_s7 + $0x28] sm:$0xff] %vm1161_vm4, %v1488_v41  ;;  %1513 = vpow2.f32 %v1039_v31  ;;  %v1043_v46 = vmul.f32 1.442695, %v990_v38  ;;  %v991_v47 = vsub.f32 0.0, %v959_v39  ;;  %v960_v11 = vadd.f32 %v1949_v48, %v905_v44 }
 0x255   :  { %v1492_v49 = vpop.eup %1491  ;;  %1515 = vrcp.f32 %v1077_v42  ;;  %v1078_v50 = vadd.f32 1.0, %v1490_v45  ;;  %v908_v51 = vpop.xlane.xlu0 %907 }
 0x256   :  { %v1494_v52 = vpop.eup %1493  ;;  %1168 = vst.msk [vmem:[%s2118_s7 + $0x30] sm:$0xff] %vm1161_vm4, %v1492_v49  ;;  %1517 = vpow2.f32 %v1041_v43  ;;  %v992_v53 = vsub.f32 0.0, %v960_v11  ;;  %v961_v54 = vadd.f32 %v1949_v48, %v908_v51  ;;  %v1045_v56 = vmul.f32 1.442695, %v991_v47 }
 0x257   :  { %v1496_v55 = vpop.eup %1495  ;;  %1519 = vrcp.f32 %v1078_v50  ;;  %v1079_v14 = vadd.f32 1.0, %v1494_v52  ;;  %v911_v57 = vpop.xlane.xlu1 %910 }
 0x258   :  { %v1498_v58 = vpop.eup %1497  ;;  %v1080_v59 = vadd.f32 1.0, %v1496_v55  ;;  %1521 = vpow2.f32 %v1043_v46  ;;  %v1047_v60 = vmul.f32 1.442695, %v992_v53  ;;  %v993_v61 = vsub.f32 0.0, %v961_v54 }
 0x259   :  { %v1500_v62 = vpop.eup %1499  ;;  %1169 = vst.msk [vmem:[%s2118_s7 + $0x38] sm:$0xff] %vm1161_vm4, %v1498_v58  ;;  %1523 = vrcp.f32 %v1079_v14  ;;  %v962_v63 = vadd.f32 %v1949_v48, %v911_v57  ;;  %v914_v0 = vpop.xlane.xlu0 %913 }
 0x25a   :  { %v1502_v1 = vpop.eup %1501  ;;  %1170 = vst.msk [vmem:[%s2118_s7 + $0x40] sm:$0xff] %vm1161_vm4, %v1500_v62  ;;  %1525 = vrcp.f32 %v1080_v59  ;;  %v963_v2 = vadd.f32 %v1949_v48, %v914_v0  ;;  %v1049_v5 = vmul.f32 1.442695, %v993_v61 }
 0x25b   :  { %v1504_v3 = vpop.eup %1503  ;;  %v1081_v4 = vadd.f32 1.0, %v1502_v1  ;;  %1527 = vpow2.f32 %v1045_v56  ;;  %v994_v6 = vsub.f32 0.0, %v962_v63  ;;  %v917_v7 = vpop.xlane.xlu1 %916 }
 0x25c   :  { %v1082_v8 = vadd.f32 1.0, %v1504_v3  ;;  %1529 = vpow2.f32 %v1047_v60  ;;  %v995_v9 = vsub.f32 0.0, %v963_v2  ;;  %v964_v10 = vadd.f32 %v1949_v48, %v917_v7 }
 0x25d   :  { %v1506_v40 = vpop.eup %1505  ;;  %1531 = vrcp.f32 %v1081_v4  ;;  %v1051_v12 = vmul.f32 1.442695, %v994_v6  ;;  %v920_v13 = vpop.xlane.xlu0 %919 }
 0x25e   :  { %v1508_v15 = vpop.eup %1507  ;;  %1171 = vst.msk [vmem:[%s2118_s7 + $0x48] sm:$0xff] %vm1161_vm4, %v1506_v40  ;;  %1533 = vrcp.f32 %v1082_v8  ;;  %v1053_v16 = vmul.f32 1.442695, %v995_v9  ;;  %v996_v17 = vsub.f32 0.0, %v964_v10  ;;  %v965_v18 = vadd.f32 %v1949_v48, %v920_v13 }
 0x25f   :  { %v1510_v19 = vpop.eup %1509  ;;  %1172 = vst.msk [vmem:[%s2118_s7 + $0x50] sm:$0xff] %vm1161_vm4, %v1508_v15  ;;  %1535 = vpow2.f32 %v1049_v5  ;;  %v923_v20 = vpop.xlane.xlu1 %922 }
 0x260   :  { %v1512_v21 = vpop.eup %1511  ;;  %v1083_v22 = vadd.f32 1.0, %v1510_v19  ;;  %1537 = vpow2.f32 %v1051_v12  ;;  %v1055_v23 = vmul.f32 1.442695, %v996_v17  ;;  %v997_v24 = vsub.f32 0.0, %v965_v18 }
 0x261   :  { %v1514_v25 = vpop.eup %1513  ;;  %1173 = vst.msk [vmem:[%s2118_s7 + $0x58] sm:$0xff] %vm1161_vm4, %v1512_v21  ;;  %1539 = vpow2.f32 %v1053_v16  ;;  %v966_v26 = vadd.f32 %v1949_v48, %v923_v20  ;;  %v926_v27 = vpop.xlane.xlu0 %925 }
 0x262   :  { %v1516_v28 = vpop.eup %1515  ;;  %1541 = vrcp.f32 %v1083_v22  ;;  %v1084_v29 = vadd.f32 1.0, %v1514_v25  ;;  %v1057_v30 = vmul.f32 1.442695, %v997_v24  ;;  %v967_v31 = vadd.f32 %v1949_v48, %v926_v27 }
 0x263   :  { %v1518_v32 = vpop.eup %1517  ;;  %1174 = vst.msk [vmem:[%s2118_s7 + $0x60] sm:$0xff] %vm1161_vm4, %v1516_v28  ;;  %1543 = vpow2.f32 %v1055_v23  ;;  %v998_v33 = vsub.f32 0.0, %v966_v26  ;;  %v929_v34 = vpop.xlane.xlu1 %928 }
 0x264   :  { %v1520_v35 = vpop.eup %1519  ;;  %1545 = vrcp.f32 %v1084_v29  ;;  %v1085_v36 = vadd.f32 1.0, %v1518_v32  ;;  %v999_v37 = vsub.f32 0.0, %v967_v31  ;;  %v968_v38 = vadd.f32 %v1949_v48, %v929_v34 }
 0x265   :  { %v1522_v39 = vpop.eup %1521  ;;  %1175 = vst.msk [vmem:[%s2118_s7 + $0x68] sm:$0xff] %vm1161_vm4, %v1520_v35  ;;  %1547 = vpow2.f32 %v1057_v30  ;;  %v1059_v41 = vmul.f32 1.442695, %v998_v33 }
 0x266   :  { %v1524_v42 = vpop.eup %1523  ;;  %1549 = vrcp.f32 %v1085_v36  ;;  %v1086_v43 = vadd.f32 1.0, %v1522_v39  ;;  %v1061_v44 = vmul.f32 1.442695, %v999_v37  ;;  %v1000_v45 = vsub.f32 0.0, %v968_v38 }
 0x267   :  { %v1526_v46 = vpop.eup %1525  ;;  %1176 = vst.msk [vmem:[%s2118_s7 + $0x70] sm:$0xff] %vm1161_vm4, %v1524_v42  ;;  %1551 = vpow2.f32 %v1059_v41 }
 0x268   :  { %v1528_v48 = vpop.eup %1527  ;;  %1177 = vst.msk [vmem:[%s2118_s7 + $0x78] sm:$0xff] %vm1161_vm4, %v1526_v46  ;;  %1553 = vrcp.f32 %v1086_v43  ;;  %v1063_v47 = vmul.f32 1.442695, %v1000_v45 }
 0x269   :  { %v1530_v11 = vpop.eup %1529  ;;  %v1087_v49 = vadd.f32 1.0, %v1528_v48  ;;  %1555 = vpow2.f32 %v1061_v44 }
 0x26a   :  { %v1532_v50 = vpop.eup %1531  ;;  %v1088_v51 = vadd.f32 1.0, %v1530_v11  ;;  %1557 = vpow2.f32 %v1063_v47 }
 0x26b   :  { %v1534_v52 = vpop.eup %1533  ;;  %1178 = vst.msk [vmem:[%s2118_s7 + $0x80] sm:$0xff] %vm1161_vm4, %v1532_v50  ;;  %1559 = vrcp.f32 %v1087_v49 }
 0x26c   :  { %v1536_v53 = vpop.eup %1535  ;;  %1179 = vst.msk [vmem:[%s2118_s7 + $0x88] sm:$0xff] %vm1161_vm4, %v1534_v52  ;;  %1561 = vrcp.f32 %v1088_v51 }
 0x26d   :  { %v1538_v54 = vpop.eup %1537  ;;  %v1089_v55 = vadd.f32 1.0, %v1536_v53 }
 0x26e   :  { %v1540_v14 = vpop.eup %1539  ;;  %v1090_v56 = vadd.f32 1.0, %v1538_v54 }
 0x26f   :  { %v1542_v57 = vpop.eup %1541  ;;  %1563 = vrcp.f32 %v1089_v55  ;;  %v1091_v58 = vadd.f32 1.0, %v1540_v14 }
 0x270   :  { %v1544_v59 = vpop.eup %1543  ;;  %1180 = vst.msk [vmem:[%s2118_s7 + $0x90] sm:$0xff] %vm1161_vm4, %v1542_v57  ;;  %1565 = vrcp.f32 %v1090_v56 }
 0x271   :  { %v1546_v60 = vpop.eup %1545  ;;  %1567 = vrcp.f32 %v1091_v58  ;;  %v1092_v61 = vadd.f32 1.0, %v1544_v59 }
 0x272   :  { %v1548_v62 = vpop.eup %1547  ;;  %1181 = vst.msk [vmem:[%s2118_s7 + $0x98] sm:$0xff] %vm1161_vm4, %v1546_v60 }
 0x273   :  { %v1550_v63 = vpop.eup %1549  ;;  %1569 = vrcp.f32 %v1092_v61  ;;  %v1093_v0 = vadd.f32 1.0, %v1548_v62 }
 0x274   :  { %v1552_v1 = vpop.eup %1551  ;;  %1182 = vst.msk [vmem:[%s2118_s7 + $0xa0] sm:$0xff] %vm1161_vm4, %v1550_v63 }
 0x275   :  { %v1554_v2 = vpop.eup %1553  ;;  %1571 = vrcp.f32 %v1093_v0  ;;  %v1094_v3 = vadd.f32 1.0, %v1552_v1 }
 0x276   :  { %v1556_v4 = vpop.eup %1555  ;;  %1183 = vst.msk [vmem:[%s2118_s7 + $0xa8] sm:$0xff] %vm1161_vm4, %v1554_v2 }
 0x277   :  { %v1558_v5 = vpop.eup %1557  ;;  %1573 = vrcp.f32 %v1094_v3  ;;  %v1095_v6 = vadd.f32 1.0, %v1556_v4 }
 0x278   :  { %v1560_v7 = vpop.eup %1559  ;;  %v1096_v8 = vadd.f32 1.0, %v1558_v5 }
 0x279   :  { %v1562_v9 = vpop.eup %1561  ;;  %1184 = vst.msk [vmem:[%s2118_s7 + $0xb0] sm:$0xff] %vm1161_vm4, %v1560_v7  ;;  %1575 = vrcp.f32 %v1095_v6 }
 0x27a   :  { %1185 = vst.msk [vmem:[%s2118_s7 + $0xb8] sm:$0xff] %vm1161_vm4, %v1562_v9  ;;  %1577 = vrcp.f32 %v1096_v8 }
 0x27c   :  { %v1564_v10 = vpop.eup %1563 }
 0x27d   :  { %v1566_v40 = vpop.eup %1565  ;;  %1186 = vst.msk [vmem:[%s2118_s7 + $0xc0] sm:$0xff] %vm1161_vm4, %v1564_v10 }
 0x27e   :  { %v1568_v12 = vpop.eup %1567  ;;  %1187 = vst.msk [vmem:[%s2118_s7 + $0xc8] sm:$0xff] %vm1161_vm4, %v1566_v40 }
 0x27f   :  { %1188 = vst.msk [vmem:[%s2118_s7 + $0xd0] sm:$0xff] %vm1161_vm4, %v1568_v12 }
 0x280   :  { %v1570_v13 = vpop.eup %1569 }
 0x281   :  { %1189 = vst.msk [vmem:[%s2118_s7 + $0xd8] sm:$0xff] %vm1161_vm4, %v1570_v13 }
 0x282   :  { %v1572_v15 = vpop.eup %1571 }
 0x283   :  { %1190 = vst.msk [vmem:[%s2118_s7 + $0xe0] sm:$0xff] %vm1161_vm4, %v1572_v15 }
 0x284   :  { %v1574_v16 = vpop.eup %1573 }
 0x285   :  { %1191 = vst.msk [vmem:[%s2118_s7 + $0xe8] sm:$0xff] %vm1161_vm4, %v1574_v16 }
 0x286   :  { %v1576_v17 = vpop.eup %1575 }
 0x287   :  { %v1578_v18 = vpop.eup %1577  ;;  %1192 = vst.msk [vmem:[%s2118_s7 + $0xf0] sm:$0xff] %vm1161_vm4, %v1576_v17 }
 0x288   :  { %1193 = vst.msk [vmem:[%s2118_s7 + $0xf8] sm:$0xff] %vm1161_vm4, %v1578_v18 }

</bundles_post_ra>
